<compile_context>
chip_gen: v5e
topology: v5e:2x2
jax: 0.10.0
libtpu: 0.0.40
codegen_flags: <defaults>
</compile_context>

<pallas_src>
import math
from functools import partial

import numpy as np
import jax
import jax.numpy as jnp
from jax import lax
from jax.experimental import pallas as pl
from jax.experimental.pallas import tpu as pltpu


def _round_up(n, m):
    return (n + m - 1) // m * m


_VMEM_LIMIT_CACHE = None


def _vmem_limit_bytes():
    """~3/4 of physical VMEM, capped at 96 MiB (v5e/v6e: 96 MiB, v7x: 48 MiB)."""
    global _VMEM_LIMIT_CACHE
    if _VMEM_LIMIT_CACHE is None:
        try:
            cap = int(pltpu.get_tpu_info().vmem_capacity_bytes)
        except Exception:                       # conservative fallback
            cap = 64 * 1024 * 1024
        _VMEM_LIMIT_CACHE = max(32 * 1024 * 1024,
                                min(cap * 3 // 4, 96 * 1024 * 1024))
    return _VMEM_LIMIT_CACHE


def _pick_tile(n, cols, *, t_max, out_bytes=4):
    """Largest power-of-two row tile (multiple of 128) whose double-buffered
    output block fits in ~1/8 of the VMEM budget; capped at the array size."""
    budget = _vmem_limit_bytes() // 8
    t = t_max
    while t > 128 and t * cols * out_bytes * 2 > budget:
        t //= 2
    return min(t, _round_up(n, 8))


# ----------------------------------------------------------------------------
# Kernel 1: row-tiled matmul (bf16 in, f32 accumulate) fused with per-batch
# GroupNorm statistics.  Each grid step writes its own (1, B, C) partial-stat
# block (no carried accumulator -> "parallel" / megacore safe); the wrapper
# reduces the tiny (grid, B, C) partials.
# ----------------------------------------------------------------------------
def _mm_stats_kernel(x_ref, w_ref, bid_ref, y_ref, sum_ref, ssq_ref, *,
                     n_valid, batch_size):
    tm = x_ref.shape[0]
    y = jnp.dot(x_ref[...], w_ref[...], preferred_element_type=jnp.float32)
    if n_valid % tm != 0:   # ragged last tile: zero rows past the array end
        rows = pl.program_id(0) * tm + lax.broadcasted_iota(jnp.int32, (tm, 1), 0)
        y = jnp.where(rows < n_valid, y, 0.0)
    y_ref[...] = y          # OOB rows of the last output block are dropped

    # per-(batch, channel) partial sums; padded/invalid rows are already zeroed
    # in y, so stray batch ids contribute nothing.
    bid = bid_ref[...]                                           # (1, tm) int32
    iota_b = lax.broadcasted_iota(jnp.int32, (batch_size, tm), 0)
    oh_t = (bid == iota_b).astype(jnp.float32)                   # (B, tm)
    sum_ref[...] = jnp.dot(oh_t, y, preferred_element_type=jnp.float32)[None]
    ssq_ref[...] = jnp.dot(oh_t, y * y, preferred_element_type=jnp.float32)[None]


def matmul_with_stats(x, w, bid, batch_size, *, t_max=2048):
    """y = x @ w on the MXU (bf16 inputs, f32 accumulation), fused with the
    per-batch sum / sum-of-squares of the rows of y (GroupNorm statistics).

    Returns (y [f32 (n, cols)], sums [(B, cols)], ssq [(B, cols)])."""
    n, k = x.shape
    cols = w.shape[1]
    if n == 0:
        z = jnp.zeros((batch_size, cols), jnp.float32)
        return jnp.zeros((0, cols), jnp.float32), z, z

    tm = _pick_tile(n, cols, t_max=t_max)
    grid = pl.cdiv(n, tm)
    # Only this tiny int32 row is padded (to grid*tm, keeping the lane-dim rule
    # satisfied); the big (n, C) operands are tiled raggedly + masked in-kernel.
    bid_row = jnp.full((1, grid * tm), -1, jnp.int32)
    bid_row = bid_row.at[0, :n].set(bid.astype(jnp.int32))

    xb = x.astype(jnp.bfloat16)
    wb = w.astype(jnp.bfloat16)

    cost = pl.CostEstimate(
        flops=2 * n * cols * (k + 2 * batch_size),
        transcendentals=0,
        bytes_accessed=2 * (n * k + k * cols) + 4 * n * cols
        + 8 * grid * batch_size * cols)

    y, sums, ssq = pl.pallas_call(
        partial(_mm_stats_kernel, n_valid=n, batch_size=batch_size),
        out_shape=(jax.ShapeDtypeStruct((n, cols), jnp.float32),
                   jax.ShapeDtypeStruct((grid, batch_size, cols), jnp.float32),
                   jax.ShapeDtypeStruct((grid, batch_size, cols), jnp.float32)),
        grid_spec=pltpu.PrefetchScalarGridSpec(
            num_scalar_prefetch=0,
            grid=(grid,),
            in_specs=[pl.BlockSpec((tm, k), lambda i: (i, 0)),
                      pl.BlockSpec((k, cols), lambda i: (0, 0)),
                      pl.BlockSpec((1, tm), lambda i: (0, i))],
            out_specs=(pl.BlockSpec((tm, cols), lambda i: (i, 0)),
                       pl.BlockSpec((1, batch_size, cols), lambda i: (i, 0, 0)),
                       pl.BlockSpec((1, batch_size, cols), lambda i: (i, 0, 0)))),
        compiler_params=pltpu.CompilerParams(
            dimension_semantics=("parallel",),
            vmem_limit_bytes=_vmem_limit_bytes()),
        cost_estimate=cost,
    )(xb, wb, bid_row)
    return y, jnp.sum(sums, axis=0), jnp.sum(ssq, axis=0)


# ----------------------------------------------------------------------------
# Kernel 2: center / scale / affine / exact GELU, row-parallel.
# ----------------------------------------------------------------------------
def _gn_apply_kernel(y_ref, bid_ref, mean_ref, istd_ref, gamma_ref, beta_ref,
                     o_ref, *, batch_size):
    y = y_ref[...]                                   # (tn, C) f32
    bid = bid_ref[...]                               # (tn, 1) int32
    mean = mean_ref[...]                             # (B, C)
    istd = istd_ref[...]                             # (B, C)

    # per-row stat broadcast: VPU where-chain (batch_size is small & static).
    # TODO(synk): for batch_size >~ 8 switch to a gather / one-hot MXU matmul.
    m = jnp.broadcast_to(mean[0:1, :], y.shape)
    s = jnp.broadcast_to(istd[0:1, :], y.shape)
    for b in range(1, batch_size):
        sel = bid == b
        m = jnp.where(sel, mean[b:b + 1, :], m)
        s = jnp.where(sel, istd[b:b + 1, :], s)

    out = (y - m) * s
    out = out * gamma_ref[...] + beta_ref[...]
    # exact GELU (torch.nn.GELU default): 0.5 * x * (1 + erf(x / sqrt(2)))
    o_ref[...] = 0.5 * out * (1.0 + lax.erf(out * 0.7071067811865476))


def groupnorm_gelu_apply(y, batch_id, mean, inv_std, gamma, beta, *, t_max=4096):
    n, c = y.shape
    if n == 0:
        return y
    batch_size = mean.shape[0]
    tn = _pick_tile(n, c, t_max=t_max)
    grid = pl.cdiv(n, tn)
    bid_col = batch_id.astype(jnp.int32).reshape(n, 1)

    cost = pl.CostEstimate(
        flops=(8 + 2 * batch_size) * n * c,
        transcendentals=n * c,
        bytes_accessed=4 * (2 * n * c + n + (2 * batch_size + 2) * c))

    return pl.pallas_call(
        partial(_gn_apply_kernel, batch_size=batch_size),
        out_shape=jax.ShapeDtypeStruct((n, c), jnp.float32),
        grid_spec=pltpu.PrefetchScalarGridSpec(
            num_scalar_prefetch=0,
            grid=(grid,),
            in_specs=[pl.BlockSpec((tn, c), lambda i: (i, 0)),
                      pl.BlockSpec((tn, 1), lambda i: (i, 0)),
                      pl.BlockSpec((batch_size, c), lambda i: (0, 0)),
                      pl.BlockSpec((batch_size, c), lambda i: (0, 0)),
                      pl.BlockSpec((1, c), lambda i: (0, 0)),
                      pl.BlockSpec((1, c), lambda i: (0, 0))],
            out_specs=pl.BlockSpec((tn, c), lambda i: (i, 0))),
        compiler_params=pltpu.CompilerParams(
            dimension_semantics=("parallel",),
            vmem_limit_bytes=_vmem_limit_bytes()),
        cost_estimate=cost,
    )(y, bid_col, mean, inv_std, gamma, beta)


# ----------------------------------------------------------------------------
# GraphUpsample.forward
# ----------------------------------------------------------------------------
def graph_upsample_forward(x, leaf_mask, numd, batch_id, batch_size,
                           w_up_flat, w_conv_t, gn_gamma, gn_beta, group,
                           eps=1e-5):
    """
    x: (Ntot, Cin) f32.  leaf_mask: host numpy bool (numd,) — boolean-mask
    indexing has data-dependent shapes, so it stays host/JAX glue (as in torch).
    batch_id: (N_out,) int — stands in for octree.batch_id(d) of output nodes.
    w_up_flat: (Cin, 8*Cin) == torch Upsample weights.flatten(1).
    w_conv_t: (Cin, Cout) == Linear weight transposed, or None when Cin == Cout.
    """
    ntot, cin = x.shape
    base = ntot - numd
    leaf_mask = np.asarray(leaf_mask)
    leaf_idx = np.nonzero(leaf_mask)[0] + base
    nonleaf_idx = np.nonzero(~leaf_mask)[0] + base

    x_nl = x[jnp.asarray(nonleaf_idx, jnp.int32)]                    # (n_nl, Cin)
    x_rest = jnp.concatenate(
        [x[:base], x[jnp.asarray(leaf_idx, jnp.int32)]], axis=0)     # (n_rest, Cin)
    n_rest, n_nl = x_rest.shape[0], x_nl.shape[0]

    if w_conv_t is None:                    # Cin == Cout: no conv / GN / GELU
        up, _, _ = matmul_with_stats(x_nl, w_up_flat,
                                     jnp.zeros((n_nl,), jnp.int32), 1)
        return jnp.concatenate([x_rest, up.reshape(-1, cin)], axis=0)

    cout = w_conv_t.shape[1]
    cpg = cout // group

    # Fuse Upsample and Conv1x1 for the non-leaf rows: composed weight
    # W_comp[i, q*Cout+co] = sum_c w_up_flat[i, q*Cin+c] * w_conv_t[c, co]
    # preserves the row-major .view(-1, C) ordering of the torch Upsample.
    # TODO(synk): hoist this einsum to module-init time if the weights are static.
    w_comp = jnp.einsum('iqc,co->iqo', w_up_flat.reshape(cin, 8, cin),
                        w_conv_t).reshape(cin, 8 * cout)

    # batch ids: rows [0, n_rest) keep their own id; the 8 children of a
    # non-leaf node all inherit the parent's batch id (true for an octree).
    bid_rest = batch_id[:n_rest]
    bid_up_parent = batch_id[n_rest:].reshape(-1, 8)[:, 0]

    # Conv matmuls with fused GroupNorm statistics: y is written exactly once
    # and never re-read for stats.
    y_rest, sum_r, ssq_r = matmul_with_stats(x_rest, w_conv_t, bid_rest, batch_size)
    y_up, sum_u, ssq_u = matmul_with_stats(x_nl, w_comp, bid_up_parent, batch_size)

    sums = sum_r + sum_u.reshape(batch_size, 8, cout).sum(axis=1)
    ssq = ssq_r + ssq_u.reshape(batch_size, 8, cout).sum(axis=1)

    # ---- tiny (B, Cout) DualOctreeGroupNorm statistics math (wrapper JAX) ----
    cnt = jnp.zeros((batch_size,), jnp.float32).at[batch_id.astype(jnp.int32)].add(1.0)
    # TODO(synk): eps kept inside the count denominator to match the reference
    # below; verify against the exact repo DualOctreeGroupNorm for bit parity.
    inv_count = 1.0 / (cnt[:, None] * cpg + eps)

    def _group_sum_bcast(t):
        g = t.reshape(batch_size, group, cpg).sum(-1, keepdims=True)
        return jnp.broadcast_to(g, (batch_size, group, cpg)).reshape(batch_size, cout)

    mean = _group_sum_bcast(sums * inv_count)
    # sum_rows (y - mean)^2 == ssq - 2*mean*sums + cnt*mean^2 (same algebra as
    # the centered reference; switch to a shifted/Welford accumulation if
    # |mean| >> std in your data).
    e2 = ssq - 2.0 * mean * sums + cnt[:, None] * mean * mean
    var = _group_sum_bcast(e2 * inv_count)
    inv_std = lax.rsqrt(var + eps)

    # TODO(synk): this concatenate is one extra HBM round trip of y; removing it
    # needs aliased offset output writes, which require n_rest to be tile-aligned.
    y = jnp.concatenate([y_rest, y_up.reshape(-1, cout)], axis=0)

    return groupnorm_gelu_apply(y, batch_id, mean, inv_std, gn_gamma, gn_beta)


# ----------------------------------------------------------------------------
# Pure-JAX reference (direct transcription of the torch modules, f32)
# ----------------------------------------------------------------------------
def reference_forward(x, leaf_mask, numd, batch_id, batch_size,
                      w_up, w_conv, gamma, beta, group):
    c = x.shape[1]
    base = x.shape[0] - numd
    outd = x[base:]
    out1 = outd[np.nonzero(~leaf_mask)[0]]
    up = (out1 @ w_up.reshape(c, c * 8)).reshape(-1, c)
    out = jnp.concatenate([x[:base], outd[np.nonzero(leaf_mask)[0]], up], axis=0)

    if w_conv is not None:
        eps = 1e-5
        y = out @ w_conv.T
        cout = y.shape[1]
        cpg = cout // group
        oh = (batch_id[:, None] == jnp.arange(batch_size)[None, :]).astype(jnp.float32)
        cnt = oh.sum(0)[:, None]                       # (B, 1) nodes per batch
        inv_count = 1.0 / (cnt * cpg + eps)
        mean = (oh.T @ y) * inv_count                  # (B, Cout)
        mean = jnp.broadcast_to(
            mean.reshape(batch_size, group, cpg).sum(-1, keepdims=True),
            (batch_size, group, cpg)).reshape(batch_size, cout)
        yc = y - mean[batch_id]
        var = (oh.T @ (yc * yc)) * inv_count
        var = jnp.broadcast_to(
            var.reshape(batch_size, group, cpg).sum(-1, keepdims=True),
            (batch_size, group, cpg)).reshape(batch_size, cout)
        inv_std = 1.0 / jnp.sqrt(var + eps)
        y = yc * inv_std[batch_id]
        y = y * gamma + beta
        y = 0.5 * y * (1.0 + lax.erf(y / jnp.sqrt(2.0)))
        out = y
    return out


if __name__ == "__main__":
    key = jax.random.PRNGKey(0)
    channels_in, channels_out = 32, 64     # Cin != Cout -> conv1x1 + GN + GELU path
    group = 32                              # DualOctreeGroupNorm default (64 % 32 == 0)
    ntot, numd = 100, 40
    batch_size = 2

    k1, k2, k3, k4, k5, k6 = jax.random.split(key, 6)
    x = jax.random.normal(k1, (ntot, channels_in), jnp.float32)

    # Upsample.weights: (C, C, 8), xavier_uniform-style deterministic init
    lim_up = math.sqrt(6.0 / (channels_in + channels_in * 8))
    w_up = jax.random.uniform(k2, (channels_in, channels_in, 8), jnp.float32,
                              -lim_up, lim_up)

    # Conv1x1: torch.nn.Linear(channels_in, channels_out, bias=False) weight (Cout, Cin)
    lim_l = 1.0 / math.sqrt(channels_in)
    w_conv = jax.random.uniform(k3, (channels_out, channels_in), jnp.float32,
                                -lim_l, lim_l)

    # DualOctreeGroupNorm affine params (perturbed so the affine path is exercised)
    gamma = jnp.ones((1, channels_out), jnp.float32) \
        + 0.1 * jax.random.normal(k4, (1, channels_out), jnp.float32)
    beta = 0.1 * jax.random.normal(k5, (1, channels_out), jnp.float32)

    # leaf mask over the last `numd` nodes (host-static, like torch bool indexing)
    leaf_mask = np.asarray(jax.random.bernoulli(k6, 0.6, (numd,)))
    n_leaf = int(leaf_mask.sum())
    n_nl = int((~leaf_mask).sum())
    n_rest = (ntot - numd) + n_leaf
    n_out = n_rest + 8 * n_nl

    # TODO(synk): a real octree.batch_id(depth) needs the Octree structure; this
    # synthetic id is octree-consistent (all 8 children share the parent's batch).
    bid_rest = (np.arange(n_rest) >= n_rest // 2).astype(np.int32)
    bid_parent = (np.arange(max(n_nl, 1))[:n_nl] >= n_nl // 2).astype(np.int32)
    batch_id = jnp.asarray(np.concatenate([bid_rest, np.repeat(bid_parent, 8)]),
                           jnp.int32)

    w_up_flat = w_up.reshape(channels_in, channels_in * 8)   # torch flatten(1)
    out = graph_upsample_forward(x, leaf_mask, numd, batch_id, batch_size,
                                 w_up_flat, w_conv.T, gamma, beta, group)
    out = jax.block_until_ready(out)
    assert out.shape == (n_out, channels_out)

    ref = reference_forward(x, leaf_mask, numd, batch_id, batch_size,
                            w_up, w_conv, gamma, beta, group)
    # tolerance admits the bf16 MXU inputs adopted per the performance review
    np.testing.assert_allclose(np.asarray(out), np.asarray(ref),
                               rtol=2e-2, atol=3e-2)
    print("KERNEL_OK")
</pallas_src>

<mosaic_0001>
module attributes {stable_mosaic.version = 11 : i64} {
  func.func @_mm_stats_kernel(%arg0: i32, %arg1: memref<80x32xbf16, #tpu.memory_space<vmem>>, %arg2: memref<32x64xbf16, #tpu.memory_space<vmem>>, %arg3: memref<1x80xi32, #tpu.memory_space<vmem>>, %arg4: memref<80x64xf32, #tpu.memory_space<vmem>>, %arg5: memref<1x2x64xf32, #tpu.memory_space<vmem>>, %arg6: memref<1x2x64xf32, #tpu.memory_space<vmem>>) attributes {dimension_semantics = [#tpu.dimension_semantics<parallel>], iteration_bounds = array<i64: 1>, scalar_prefetch = 0 : i64, scratch_operands = 0 : i64, tpu.core_type = #tpu.core_type<tc>, window_params = [{transform_indices = @transform_0, window_bounds = array<i64: 80, 32>}, {pipeline_mode = #tpu.pipeline_mode<synchronous>, transform_indices = @transform_1, window_bounds = array<i64: 32, 64>}, {transform_indices = @transform_2, window_bounds = array<i64: 1, 80>}, {transform_indices = @transform_3, window_bounds = array<i64: 80, 64>}, {transform_indices = @transform_4, window_bounds = array<i64: 1, 2, 64>}, {transform_indices = @transform_5, window_bounds = array<i64: 1, 2, 64>}]} {
    %c0 = arith.constant 0 : index
    %c0_0 = arith.constant 0 : index
    %0 = vector.load %arg1[%c0, %c0_0] : memref<80x32xbf16, #tpu.memory_space<vmem>>, vector<80x32xbf16>
    %c0_1 = arith.constant 0 : index
    %c0_2 = arith.constant 0 : index
    %1 = vector.load %arg2[%c0_1, %c0_2] : memref<32x64xbf16, #tpu.memory_space<vmem>>, vector<32x64xbf16>
    %cst = arith.constant dense<0.000000e+00> : vector<80x64xf32>
    %2 = tpu.matmul %0, %1, %cst {dimension_numbers = #tpu.dot_dimension_numbers<[1], [0], [0], [1], [0, 0, 1, 1], [], []>} : vector<80x32xbf16>, vector<32x64xbf16>, vector<80x64xf32> -> vector<80x64xf32>
    %c80_i32 = arith.constant 80 : i32
    %3 = arith.muli %arg0, %c80_i32 : i32
    %4 = tpu.iota {dimensions = array<i32: 0>} : vector<80x1xi32>
    %5 = vector.broadcast %3 : i32 to vector<80x1xi32>
    %6 = arith.addi %5, %4 : vector<80x1xi32>
    %c77_i32 = arith.constant 77 : i32
    %7 = vector.broadcast %c77_i32 : i32 to vector<80x1xi32>
    %8 = arith.cmpi slt, %6, %7 : vector<80x1xi32>
    %cst_3 = arith.constant 0.000000e+00 : f32
    %9 = vector.shape_cast %8 : vector<80x1xi1> to vector<80x1xi1>
    %10 = vector.broadcast %9 : vector<80x1xi1> to vector<80x64xi1>
    %11 = vector.broadcast %cst_3 : f32 to vector<80x64xf32>
    %12 = arith.select %10, %2, %11 : vector<80x64xi1>, vector<80x64xf32>
    %c0_4 = arith.constant 0 : index
    %c0_5 = arith.constant 0 : index
    %13 = vector.load %arg4[%c0_4, %c0_5] : memref<80x64xf32, #tpu.memory_space<vmem>>, vector<80x64xf32>
    tpu.vector_store %arg4[%c0_4, %c0_5], %12 {strides = array<i32>} : memref<80x64xf32, #tpu.memory_space<vmem>>, vector<80x64xf32>,
    %c0_6 = arith.constant 0 : index
    %c0_7 = arith.constant 0 : index
    %14 = vector.load %arg3[%c0_6, %c0_7] : memref<1x80xi32, #tpu.memory_space<vmem>>, vector<1x80xi32>
    %15 = tpu.iota {dimensions = array<i32: 0>} : vector<2x80xi32>
    %16 = vector.broadcast %14 : vector<1x80xi32> to vector<2x80xi32>
    %17 = arith.cmpi eq, %16, %15 : vector<2x80xi32>
    %18 = arith.extui %17 : vector<2x80xi1> to vector<2x80xi32>
    %19 = arith.sitofp %18 : vector<2x80xi32> to vector<2x80xf32>
    %cst_8 = arith.constant dense<0.000000e+00> : vector<2x64xf32>
    %20 = tpu.matmul %19, %12, %cst_8 {dimension_numbers = #tpu.dot_dimension_numbers<[1], [0], [0], [1], [0, 0, 1, 1], [], []>} : vector<2x80xf32>, vector<80x64xf32>, vector<2x64xf32> -> vector<2x64xf32>
    %21 = vector.shape_cast %20 : vector<2x64xf32> to vector<1x2x64xf32>
    %c0_9 = arith.constant 0 : index
    %c0_10 = arith.constant 0 : index
    %c0_11 = arith.constant 0 : index
    %22 = vector.load %arg5[%c0_9, %c0_10, %c0_11] : memref<1x2x64xf32, #tpu.memory_space<vmem>>, vector<1x2x64xf32>
    tpu.vector_store %arg5[%c0_9, %c0_10, %c0_11], %21 {strides = array<i32>} : memref<1x2x64xf32, #tpu.memory_space<vmem>>, vector<1x2x64xf32>,
    %23 = arith.mulf %12, %12 : vector<80x64xf32>
    %cst_12 = arith.constant dense<0.000000e+00> : vector<2x64xf32>
    %24 = tpu.matmul %19, %23, %cst_12 {dimension_numbers = #tpu.dot_dimension_numbers<[1], [0], [0], [1], [0, 0, 1, 1], [], []>} : vector<2x80xf32>, vector<80x64xf32>, vector<2x64xf32> -> vector<2x64xf32>
    %25 = vector.shape_cast %24 : vector<2x64xf32> to vector<1x2x64xf32>
    %c0_13 = arith.constant 0 : index
    %c0_14 = arith.constant 0 : index
    %c0_15 = arith.constant 0 : index
    %26 = vector.load %arg6[%c0_13, %c0_14, %c0_15] : memref<1x2x64xf32, #tpu.memory_space<vmem>>, vector<1x2x64xf32>
    tpu.vector_store %arg6[%c0_13, %c0_14, %c0_15], %25 {strides = array<i32>} : memref<1x2x64xf32, #tpu.memory_space<vmem>>, vector<1x2x64xf32>,
    return
  }
  func.func @transform_0(%arg0: i32) -> (i32, i32) {
    %c0_i32 = arith.constant 0 : i32
    %c0_i32_0 = arith.constant 0 : i32
    return %arg0, %c0_i32 : i32, i32
  }
  func.func @transform_1(%arg0: i32) -> (i32, i32) {
    %c0_i32 = arith.constant 0 : i32
    %c0_i32_0 = arith.constant 0 : i32
    %c0_i32_1 = arith.constant 0 : i32
    return %c0_i32, %c0_i32_0 : i32, i32
  }
  func.func @transform_2(%arg0: i32) -> (i32, i32) {
    %c0_i32 = arith.constant 0 : i32
    %c0_i32_0 = arith.constant 0 : i32
    return %c0_i32, %arg0 : i32, i32
  }
  func.func @transform_3(%arg0: i32) -> (i32, i32) {
    %c0_i32 = arith.constant 0 : i32
    %c0_i32_0 = arith.constant 0 : i32
    return %arg0, %c0_i32 : i32, i32
  }
  func.func @transform_4(%arg0: i32) -> (i32, i32, i32) {
    %c0_i32 = arith.constant 0 : i32
    %c0_i32_0 = arith.constant 0 : i32
    %c0_i32_1 = arith.constant 0 : i32
    return %arg0, %c0_i32, %c0_i32_0 : i32, i32, i32
  }
  func.func @transform_5(%arg0: i32) -> (i32, i32, i32) {
    %c0_i32 = arith.constant 0 : i32
    %c0_i32_0 = arith.constant 0 : i32
    %c0_i32_1 = arith.constant 0 : i32
    return %arg0, %c0_i32, %c0_i32_0 : i32, i32, i32
  }
}

</mosaic_0001>

<bundles_post_ra>
// kernel: tpu_custom_call.1
= control target key start
LH: loop header
LB: loop body
LE: loop exit
PB: predicated region body
PF: predicated region fallthrough
CT: control target
= control target key end

     0   :  { %11 = vsyncpa [#allocation3], 0  ;;  %s502_s0 = inlined_call_operand.vmem [shape: bf16[77,32], index: 0, kind: input, shape index: {}]   ;;  %s503_s1 = inlined_call_operand.vmem [shape: bf16[32,64], index: 1, kind: input, shape index: {}]   ;;  %s504_s2 = inlined_call_operand.vmem [shape: s32[1,80], index: 2, kind: input, shape index: {}]   ;;  %s505_s3 = inlined_call_operand.vmem [shape: f32[77,64], index: 3, kind: output, shape index: {0}]   ;;  %s506_s4 = inlined_call_operand.hbm [shape: f32[1,2,64], index: 4, kind: output, shape index: {1}]   ;;  %s507_s5 = inlined_call_operand.hbm [shape: f32[1,2,64], index: 5, kind: output, shape index: {2}]  }
   0x1   :  { %v336_v0 = vld [vmem:[%s503_s1 + $0x8] sm:$0xff]  ;;  %v335_v1 = vld [vmem:[%s503_s1] sm:$0xff] }
   0x2   :  { %339 = vmatpush.bf16.msra.mxu3 %v336_v0  ;;  %338 = vmatpush.bf16.msra.mxu2 %v336_v0 }
   0x3   :  { %12 = vsyncpa [#allocation5], 0  ;;  %337 = vmatpush.bf16.msra.mxu1 %v336_v0  ;;  %93 = vmatpush.bf16.msra.mxu0 %v336_v0  ;;  %v333_v2 = vld [vmem:[%s502_s0 + $0x18] sm:$0xff]  ;;  %v332_v3 = vld [vmem:[%s502_s0 + $0x10] sm:$0xff]  ;;  %vm71_vm0 = vcmask 261120   ;;  %vm184_vm1 = vcmask 523264   ;;  %v122_v15 = vlaneseq }
   0x4   :  { %v331_v4 = vld [vmem:[%s502_s0 + $0x8] sm:$0xff]  ;;  %v330_v5 = vld [vmem:[%s502_s0] sm:$0xff]  ;;  %v399_v31 = vmov 0.0   ;;  %vm200_vm4 = vcmask 654336   ;;  %s266_s28 = sshll.u32 %s506_s4, 4  ;;  %vm224_vm5 = vcmask 517120   ;;  %s267_s28 = int_to_ptr.hbm [resolvable:$true] %s266_s28 }
   0x5   :  { %v334_v6 = vld [vmem:[%s502_s0 + $0x20] sm:$0xff]  ;;  %v123_v16 = vshrl.u32 %v122_v15, 7  ;;  %s401_s29 = smov [#allocation4]   ;;  %s277_s8 = sshll.u32 %s507_s5, 4  ;;  %s278_s8 = int_to_ptr.hbm [resolvable:$true] %s277_s8 }
   0x6   :  { %342 = vmatpush.bf16.msra.mxu3 %v335_v1  ;;  %341 = vmatpush.bf16.msra.mxu2 %v335_v1  ;;  %v346_v27 = vld [vmem:[%s504_s2] ss:$0 sm:$0xff]  ;;  %s400_s2 = smov [#allocation2]   ;;  %s275_s30 = sshll.u32 %s401_s29, 4  ;;  %s276_s30 = int_to_ptr.vmem [resolvable:$true] %s275_s30 }
   0x7   :  { %340 = vmatpush.bf16.msra.mxu1 %v335_v1  ;;  %94 = vmatpush.bf16.msra.mxu0 %v335_v1  ;;  %v132_v18 = vadd.s32 72, %v123_v16  ;;  %vm197_vm3 = vcmp.eq.s32.totalorder %v346_v27, %v123_v16 }
   0x8   :  { %v326_v32 = vsel %vm197_vm3, 1.0, %v399_v31 }
   0x9   :  { %324 = vmatmul.msk.bf16.vlgmr.msra.gmra.mxu3 %vm71_vm0, %v333_v2  ;;  %323 = vmatmul.msk.bf16.vlgmr.msra.gmra.mxu2 %vm71_vm0, %v332_v3  ;;  %vm153_vm2 = vcmp.lt.s32.totalorder %v132_v18, 77 }
   0xa   :  { %322 = vmatmul.msk.bf16.vlgmr.msra.gmra.mxu1 %vm71_vm0, %v331_v4  ;;  %321 = vmatmul.msk.bf16.vlgmr.msra.gmra.mxu0 %vm71_vm0, %v330_v5 }
  0x19   :  { %325 = vmatmul.msk.bf16.gmra.mxu3 %vm71_vm0, %v334_v6 }
  0x87   :  { %v101_v7 = vpop.f32.mrf.mxu1  ;;  %v96_v8 = vpop.f32.mrf.mxu0 }
  0x88   :  { %187 = vst.msk [vmem:[%s505_s3 + $0x10] sm:$0xff] %vm184_vm1, %v101_v7  ;;  %v228_v29 = vmul.f32 %v101_v7, %v101_v7  ;;  %v226_v33 = vmul.f32 %v96_v8, %v96_v8 }
  0x89   :  { %185 = vst.msk [vmem:[%s505_s3] sm:$0xff] %vm184_vm1, %v96_v8 }
  0x8c   :  { %v111_v9 = vpop.f32.mrf.mxu3  ;;  %v106_v10 = vpop.f32.mrf.mxu2 }
  0x8d   :  { %191 = vst.msk [vmem:[%s505_s3 + $0x30] sm:$0xff] %vm184_vm1, %v111_v9  ;;  %v232_v24 = vmul.f32 %v111_v9, %v111_v9  ;;  %v230_v26 = vmul.f32 %v106_v10, %v106_v10 }
  0x8e   :  { %189 = vst.msk [vmem:[%s505_s3 + $0x20] sm:$0xff] %vm184_vm1, %v106_v10 }
  0x8f   :  { %v103_v11 = vpop.f32.mrf.mxu1  ;;  %v98_v12 = vpop.f32.mrf.mxu0 }
  0x90   :  { %188 = vst.msk [vmem:[%s505_s3 + $0x18] sm:$0xff] %vm184_vm1, %v103_v11  ;;  %v229_v28 = vmul.f32 %v103_v11, %v103_v11  ;;  %v227_v30 = vmul.f32 %v98_v12, %v98_v12 }
  0x91   :  { %186 = vst.msk [vmem:[%s505_s3 + $0x8] sm:$0xff] %vm184_vm1, %v98_v12 }
  0x94   :  { %v113_v13 = vpop.f32.mrf.mxu3  ;;  %v108_v14 = vpop.f32.mrf.mxu2 }
  0x95   :  { %192 = vst.msk [vmem:[%s505_s3 + $0x38] sm:$0xff] %vm184_vm1, %v113_v13  ;;  %v233_v23 = vmul.f32 %v113_v13, %v113_v13  ;;  %v231_v25 = vmul.f32 %v108_v14, %v108_v14 }
  0x96   :  { %190 = vst.msk [vmem:[%s505_s3 + $0x28] sm:$0xff] %vm184_vm1, %v108_v14 }
  0x9c   :  { %v116_v17 = vpop.f32.mrf.mxu3 }
  0x9d   :  { %193 = vst.msk [vmem:[%s505_s3 + $0x40] sm:$0xff] %vm184_vm1, %v116_v17  ;;  %v234_v22 = vmul.f32 %v116_v17, %v116_v17 }
  0xa4   :  { %v118_v19 = vpop.f32.mrf.mxu3 }
  0xa5   :  { %v183_v20 = vsel %vm153_vm2, %v118_v19, 0.0  ;;  %327 = vmatpush.msk.msrb.mxu1 %vm153_vm2, %v118_v19 }
  0xa6   :  { %194 = vst.msk [vmem:[%s505_s3 + $0x48] sm:$0xff] %vm184_vm1, %v183_v20  ;;  %v235_v21 = vmul.f32 %v183_v20, %v183_v20  ;;  %s264_s3 = sshll.u32 %s400_s2, 4  ;;  %s265_s3 = int_to_ptr.vmem [resolvable:$true] %s264_s3 }
  0xa7   :  { %211 = vmatpush.msrb.mxu1 %v116_v17 }
  0xa8   :  { %242 = vmatpush.msrb.mxu2 %v235_v21 }
  0xa9   :  { %212 = vmatpush.msrb.mxu1 %v113_v13 }
  0xaa   :  { %243 = vmatpush.msrb.mxu2 %v234_v22 }
  0xab   :  { %213 = vmatpush.msrb.mxu1 %v111_v9 }
  0xac   :  { %244 = vmatpush.msrb.mxu2 %v233_v23 }
  0xad   :  { %214 = vmatpush.msrb.mxu1 %v108_v14 }
  0xae   :  { %245 = vmatpush.msrb.mxu2 %v232_v24 }
  0xaf   :  { %215 = vmatpush.msrb.mxu1 %v106_v10 }
  0xb0   :  { %246 = vmatpush.msrb.mxu2 %v231_v25 }
  0xb1   :  { %216 = vmatpush.msrb.mxu1 %v103_v11 }
  0xb2   :  { %247 = vmatpush.msrb.mxu2 %v230_v26 }
  0xb3   :  { %217 = vmatpush.msrb.mxu1 %v101_v7 }
  0xb4   :  { %248 = vmatpush.msrb.mxu2 %v229_v28 }
  0xb5   :  { %218 = vmatpush.msrb.mxu1 %v98_v12 }
  0xb6   :  { %249 = vmatpush.msrb.mxu2 %v228_v29 }
  0xb7   :  { %219 = vmatpush.msrb.mxu1 %v96_v8 }
  0xb8   :  { %250 = vmatpush.msrb.mxu2 %v227_v30  ;;  %328 = vmatmul.msk.f32.vlgmr.msrb.gmra.mxu1 %vm200_vm4, %v326_v32 }
  0xba   :  { %251 = vmatpush.msrb.mxu2 %v226_v33 }
  0xbb   :  { %329 = vmatmul.msk.f32.vlgmr.msrb.gmra.mxu2 %vm200_vm4, %v326_v32 }
 0x135   :  { %v221_v34 = vpop.f32.mrf.mxu1 }
 0x136   :  { %225 = vst.msk [vmem:[#allocation2] sm:$0x3] %vm224_vm5, %v221_v34 }
 0x137   :  { %269 = dma.vmem_to_hbm [thread:$0]  %s265_s3, 32, %s267_s28, [#allocation3]  }
 0x13e   :  { %v253_v35 = vpop.f32.mrf.mxu2 }
 0x13f   :  { %256 = vst.msk [vmem:[#allocation4] sm:$0x3] %vm224_vm5, %v253_v35 }
 0x140   :  { %280 = dma.vmem_to_hbm [thread:$0]  %s276_s30, 32, %s278_s8, [#allocation5]  }
 0x141   :  { %395 = dma.done.wait [#allocation3], 32  }
 0x142   :  { %396 = vsyncadd [#allocation3], 4294967264 }
 0x143   :  { %397 = dma.done.wait [#allocation5], 32  }
 0x144   :  { %398 = vsyncadd [#allocation5], 4294967264 }
 0x145   :  { %291 = vsyncpa [#allocation3], 1 }
 0x146   :  { %292 = vsyncpa [#allocation5], 1 }

</bundles_post_ra>
